<compile_context>
chip_gen: v7x
topology: tpu7x:2x2x1
jax: 0.10.0
libtpu: 0.0.40
codegen_flags: <defaults>
</compile_context>

<pallas_src>
import functools

import jax
import jax.numpy as jnp
from jax import lax
from jax.experimental import pallas as pl
from jax.experimental.pallas import tpu as pltpu


def _conv1x1_kernel(x_ref, w_ref, b_ref, o_ref):
    # x_ref: (tm, C)   w_ref: (NL, C)   b_ref: (NL, 1)   o_ref: (NL, tm)
    # Contract last dims of both operands (A @ B^T pattern) -> (NL, tm).
    # The transpose lands on the tiny weight/result, never on the big x tile.
    acc = lax.dot_general(
        w_ref[...],
        x_ref[...],
        dimension_numbers=(((1,), (1,)), ((), ())),
        preferred_element_type=jnp.float32,
    )
    o_ref[...] = (acc + b_ref[...]).astype(o_ref.dtype)


def _vmem_capacity_bytes():
    """Per-core VMEM capacity; conservative fallback if query is unavailable."""
    try:
        return int(pltpu.get_tpu_info().vmem_capacity_bytes)
    except Exception:
        return 64 * 1024 * 1024  # v7x per-TC VMEM (smallest of current gens)


def _pick_row_tile(m_total, in_channels, num_labels, x_itemsize, out_itemsize,
                   vmem_cap):
    """Largest row tile (multiple of 128) whose double-buffered slabs fit the
    generation-aware VMEM budget, capped so the grid has >= 2 steps when the
    problem allows it (so v7x's two TensorCores both get work)."""
    # Slab budget for (x tile + out tile), both double-buffered:
    #   v5e/v6e (128 MiB VMEM) and v7x (64 MiB VMEM) -> 32 MiB.
    slab_budget = min(vmem_cap // 2, 32 * 1024 * 1024)
    per_row_bytes = 2 * (in_channels * x_itemsize + num_labels * out_itemsize)
    tm_cap = (slab_budget // max(1, per_row_bytes)) // 128 * 128
    tm_cap = max(128, min(tm_cap, 32768))
    # Ensure at least two grid steps whenever M > 128 rows.
    tm_two_steps = max(128, pl.cdiv(pl.cdiv(m_total, 2), 128) * 128)
    return min(tm_cap, tm_two_steps)


@functools.partial(jax.jit, static_argnames=("token_h", "token_w"))
def linear_classifier_forward(embeddings, weight, bias, *, token_h, token_w):
    """Forward pass matching the PyTorch LinearClassifier.

    embeddings: any shape that reshapes to (-1, token_h, token_w, in_channels)
                (e.g. (B, H*W, C) patch tokens from DINOv2)
    weight:     (num_labels, in_channels)  -- Conv2d weight with the 1x1 squeezed
    bias:       (num_labels,)
    returns:    (B, num_labels, token_h, token_w)   (NCHW, like PyTorch Conv2d)
    """
    num_labels, in_channels = weight.shape

    total = 1
    for d in embeddings.shape:
        total *= d
    denom = token_h * token_w * in_channels
    if total % denom != 0:
        raise ValueError(
            f"embeddings with {total} elements cannot be reshaped to "
            f"(-1, {token_h}, {token_w}, {in_channels}); check in_channels/token size."
        )

    x_nhwc = embeddings.reshape(-1, token_h, token_w, in_channels)
    batch = x_nhwc.shape[0]
    m_total = batch * token_h * token_w
    x_flat = x_nhwc.reshape(m_total, in_channels)

    out_dtype = embeddings.dtype
    x_itemsize = jnp.dtype(embeddings.dtype).itemsize
    out_itemsize = jnp.dtype(out_dtype).itemsize
    w_itemsize = jnp.dtype(weight.dtype).itemsize

    vmem_cap = _vmem_capacity_bytes()
    tm = _pick_row_tile(m_total, in_channels, num_labels, x_itemsize,
                        out_itemsize, vmem_cap)
    grid_m = pl.cdiv(m_total, tm)
    # NOTE: no jnp.pad of x_flat -- ragged final block is handled by the pipeline.

    bias2d = bias.reshape(num_labels, 1)

    # Explicit VMEM limit: enough for the double-buffered slabs + margin,
    # never above the physical per-core capacity (keeps v7x safe).
    needed_vmem = (2 * tm * (in_channels * x_itemsize + num_labels * out_itemsize)
                   + 2 * num_labels * (in_channels + 1) * w_itemsize)
    vmem_limit = min(vmem_cap - (4 << 20), needed_vmem + (12 << 20))
    vmem_limit = int(min(max(vmem_limit, 32 << 20), vmem_cap))

    cost = pl.CostEstimate(
        flops=2 * m_total * in_channels * num_labels,
        transcendentals=0,
        bytes_accessed=(m_total * in_channels * x_itemsize
                        + num_labels * in_channels * w_itemsize
                        + num_labels * jnp.dtype(bias.dtype).itemsize
                        + num_labels * m_total * out_itemsize),
    )

    out_t = pl.pallas_call(
        _conv1x1_kernel,
        out_shape=jax.ShapeDtypeStruct((num_labels, m_total), out_dtype),
        grid_spec=pltpu.PrefetchScalarGridSpec(
            num_scalar_prefetch=0,
            grid=(grid_m,),
            in_specs=[
                # TODO(synk): sweep pipeline_mode=pl.Buffered(3) on this spec for v7x.
                pl.BlockSpec((tm, in_channels), lambda i: (i, 0)),
                pl.BlockSpec((num_labels, in_channels), lambda i: (0, 0)),
                pl.BlockSpec((num_labels, 1), lambda i: (0, 0)),
            ],
            out_specs=pl.BlockSpec((num_labels, tm), lambda i: (0, i)),
        ),
        compiler_params=pltpu.CompilerParams(
            dimension_semantics=("parallel",),
            vmem_limit_bytes=vmem_limit,
        ),
        cost_estimate=cost,
    )(x_flat, weight, bias2d)

    # TODO(synk): for large num_labels (e.g. 150-class seg heads) emit output
    # directly in (B, NL, H*W) layout to skip this extra pass over the output.
    out = out_t.reshape(num_labels, batch, token_h, token_w)
    return jnp.transpose(out, (1, 0, 2, 3))


if __name__ == "__main__":
    # Small shapes consistent with the module: DINO patch-14 tokens (ragged vs
    # the 128-row tile, exercising the no-pad boundary-block path).
    batch = 2
    token_h = 14
    token_w = 14
    in_channels = 32
    num_labels = 1  # PyTorch default

    key = jax.random.PRNGKey(0)
    k_x, k_w, k_b = jax.random.split(key, 3)

    # embeddings as (B, H*W, C) patch tokens
    x = jax.random.normal(k_x, (batch, token_h * token_w, in_channels), jnp.float32)

    # Conv2d weight (NL, C, 1, 1) squeezed -> (NL, C); bias (NL,).
    fan_in = in_channels  # 1x1 kernel
    bound = 1.0 / (fan_in ** 0.5)
    weight = jax.random.uniform(k_w, (num_labels, in_channels), jnp.float32,
                                minval=-bound, maxval=bound)
    bias = jax.random.uniform(k_b, (num_labels,), jnp.float32,
                              minval=-bound, maxval=bound)

    out = linear_classifier_forward(x, weight, bias,
                                    token_h=token_h, token_w=token_w)
    out = jax.block_until_ready(out)

    # Plain-JAX reference of the same math (NHWC matmul -> NCHW).
    ref = x.reshape(-1, token_h, token_w, in_channels) @ weight.T + bias
    ref = jnp.transpose(ref, (0, 3, 1, 2))
    assert out.shape == (batch, num_labels, token_h, token_w), out.shape
    assert jnp.allclose(out, ref, atol=1e-5, rtol=1e-5)

    print("KERNEL_OK")
</pallas_src>

<mosaic_0001>
module attributes {stable_mosaic.version = 11 : i64} {
  func.func @_conv1x1_kernel(%arg0: i32, %arg1: memref<256x32xf32, #tpu.memory_space<vmem>>, %arg2: memref<1x32xf32, #tpu.memory_space<vmem>>, %arg3: memref<1x1xf32, #tpu.memory_space<vmem>>, %arg4: memref<1x256xf32, #tpu.memory_space<vmem>>) attributes {dimension_semantics = [#tpu.dimension_semantics<parallel>], iteration_bounds = array<i64: 2>, scalar_prefetch = 0 : i64, scratch_operands = 0 : i64, tpu.core_type = #tpu.core_type<tc>, window_params = [{transform_indices = @transform_0, window_bounds = array<i64: 256, 32>}, {pipeline_mode = #tpu.pipeline_mode<synchronous>, transform_indices = @transform_1, window_bounds = array<i64: 1, 32>}, {pipeline_mode = #tpu.pipeline_mode<synchronous>, transform_indices = @transform_2, window_bounds = array<i64: 1, 1>}, {transform_indices = @transform_3, window_bounds = array<i64: 1, 256>}]} {
    %c0 = arith.constant 0 : index
    %c0_0 = arith.constant 0 : index
    %0 = vector.load %arg2[%c0, %c0_0] : memref<1x32xf32, #tpu.memory_space<vmem>>, vector<1x32xf32>
    %c0_1 = arith.constant 0 : index
    %c0_2 = arith.constant 0 : index
    %1 = vector.load %arg1[%c0_1, %c0_2] : memref<256x32xf32, #tpu.memory_space<vmem>>, vector<256x32xf32>
    %cst = arith.constant dense<0.000000e+00> : vector<1x256xf32>
    %2 = tpu.matmul %0, %1, %cst {dimension_numbers = #tpu.dot_dimension_numbers<[1], [1], [0], [0], [0, 0, 1, 0], [], []>} : vector<1x32xf32>, vector<256x32xf32>, vector<1x256xf32> -> vector<1x256xf32>
    %c0_3 = arith.constant 0 : index
    %c0_4 = arith.constant 0 : index
    %3 = vector.load %arg3[%c0_3, %c0_4] : memref<1x1xf32, #tpu.memory_space<vmem>>, vector<1x1xf32>
    %4 = vector.broadcast %3 : vector<1x1xf32> to vector<1x256xf32>
    %5 = arith.addf %2, %4 : vector<1x256xf32>
    %c0_5 = arith.constant 0 : index
    %c0_6 = arith.constant 0 : index
    %6 = vector.load %arg4[%c0_5, %c0_6] : memref<1x256xf32, #tpu.memory_space<vmem>>, vector<1x256xf32>
    tpu.vector_store %arg4[%c0_5, %c0_6], %5 {strides = array<i32>} : memref<1x256xf32, #tpu.memory_space<vmem>>, vector<1x256xf32>,
    return
  }
  func.func @transform_0(%arg0: i32) -> (i32, i32) {
    %c0_i32 = arith.constant 0 : i32
    %c0_i32_0 = arith.constant 0 : i32
    return %arg0, %c0_i32 : i32, i32
  }
  func.func @transform_1(%arg0: i32) -> (i32, i32) {
    %c0_i32 = arith.constant 0 : i32
    %c0_i32_0 = arith.constant 0 : i32
    %c0_i32_1 = arith.constant 0 : i32
    return %c0_i32, %c0_i32_0 : i32, i32
  }
  func.func @transform_2(%arg0: i32) -> (i32, i32) {
    %c0_i32 = arith.constant 0 : i32
    %c0_i32_0 = arith.constant 0 : i32
    %c0_i32_1 = arith.constant 0 : i32
    return %c0_i32, %c0_i32_0 : i32, i32
  }
  func.func @transform_3(%arg0: i32) -> (i32, i32) {
    %c0_i32 = arith.constant 0 : i32
    %c0_i32_0 = arith.constant 0 : i32
    return %c0_i32, %arg0 : i32, i32
  }
}

</mosaic_0001>

<bundles_post_ra>
// kernel: linear_classifier_forward.1
= control target key start
LH: loop header
LB: loop body
LE: loop exit
PB: predicated region body
PF: predicated region fallthrough
CT: control target
= control target key end

     0   :  { %s650_s14 = smov 0   ;;  %s752_s0 = inlined_call_operand.vmem [shape: f32[392,32], index: 0, kind: input, shape index: {}]   ;;  %s753_s1 = inlined_call_operand.vmem [shape: f32[1,32], index: 1, kind: input, shape index: {}]   ;;  %s754_s2 = inlined_call_operand.<no memory space> [shape: f32[1,1], index: 2, kind: input, shape index: {}]   ;;  %s755_s3 = inlined_call_operand.vmem [shape: f32[1,392], index: 3, kind: output, shape index: {}]  }
   0x1   :  { %v8_v0 = vstv %s754_s2 }
   0x2   :  { %9 = vst [vmem:[#allocation2] sm:$0x1] %v8_v0 }
   0x3 LB: > { %s481_s15 = sadd.s32 4294967295, %s623_s14   ;;  %p485_p0 = scmp.ge.s32.totalorder %s623_s14, 1  ;;  %s623_s14 = sphi %s650_s14, %s15_s14  }
   0x4   : > { %p148_p1 = scmp.lt.s32.totalorder %s623_s14, 3 }
   0x6   : > { %p149_p2 = pnand %p485_p0, %p148_p1 }
   0x7   : > { %s486_s16 = sshll.u32 (!%p149_p2), %s481_s15, 5  ;;  %vm237_vm0 = vcmask (!%p149_p2), 261120   ;;  %v663_v1 = vld [vmem:[%s753_s1] sm:$0x1] (!%p149_p2)  ;;  %v625_v2 = vmov (!%p149_p2), 0   ;;  %v233_v53 = vlaneseq (!%p149_p2)  ;;  %s488_s22 = sshll.u32 (!%p149_p2), %s481_s15, 1 }
   0x8   : > { %152 = sbr.rel (%p149_p2) target bundleno = 307 (0x133), region = 32  ;;  %p180_p3 = scmp.lt.s32.totalorder (!%p149_p2), %s486_s16, 48  ;;  %556 = vmatprep.mubr.msk.f32.mxu0 (!%p149_p2), %vm237_vm0, %v663_v1  ;;  %616 = vset.pattern.permute.xlu0 (!%p149_p2), %v625_v2  ;;  %vm674_vm1 = vmpackc.low (!%p149_p2), %vm237_vm0, %vm237_vm0  ;;  %v626_v57 = vmov (!%p149_p2), 1966171168  }
   0x9   : > { %v227_v3 = vld [vmem:[#allocation2] sm:$0x1] (!%p149_p2)  ;;  %v234_v54 = vshrl.u32 (!%p149_p2), %v233_v53, 7  ;;  %v412_v58 = vunpack.c.l.s4 (!%p149_p2), %v626_v57  ;;  %p190_p4 = scmp.lt.s32.totalorder (!%p149_p2), %s488_s22, 3  ;;  %vm428_vm2 = vcmp.lt.s32.totalorder (!%p149_p2), %v233_v53, 256 }
   0xa   : > { %230 = vperm.xlu0 (!%p149_p2), %616, %v227_v3  }
   0xb   : > { %v235_v55 = vsub.s32 (!%p149_p2), 0, %v234_v54  ;;  %v413_v60 = vunpack.c.0.s8 (!%p149_p2), %v412_v58 }
   0xd   : > { %v416_v2 = vsub.s32 (!%p149_p2), %v413_v60, %v234_v54 }
   0xf   : > { %s759_s16 = smov (!%p180_p3, %s486_s16), 48  ;;  %s761_s22 = smov (!%p190_p4, %s488_s22), 3 }
  0x10   : > { %s487_s18 = sshll.u32 %s759_s16, 3  ;;  %s192_s25 = scalar_lea.vmem %s755_s3, %s761_s22 }
  0x11   : > { %s670_s21 = scalar_lea.vmem %s752_s0, %s487_s18 }
  0x12   : > { %v211_v5 = vld [vmem:[%s670_s21 + $0x80] sm:$0xff]  ;;  %v212_v6 = vld [vmem:[%s670_s21 + $0x88] sm:$0xff]  ;;  %v213_v10 = vld [vmem:[%s670_s21 + $0x90] sm:$0xff] }
  0x13   : > { %v195_v7 = vld [vmem:[%s670_s21] sm:$0xff]  ;;  %v558_v8 = vpack.c.bf16 %v212_v6, %v211_v5  ;;  %v196_v9 = vld [vmem:[%s670_s21 + $0x8] sm:$0xff]  ;;  %v214_v11 = vld [vmem:[%s670_s21 + $0x98] sm:$0xff] }
  0x14   : > { %v561_v12 = vpack.c.bf16 %v196_v9, %v195_v7  ;;  %v564_v13 = vpack.c.bf16 %v214_v11, %v213_v10  ;;  %v197_v14 = vld [vmem:[%s670_s21 + $0x10] sm:$0xff]  ;;  %v198_v15 = vld [vmem:[%s670_s21 + $0x18] sm:$0xff]  ;;  %v215_v16 = vld [vmem:[%s670_s21 + $0xa0] sm:$0xff] }
  0x15   : > { %560 = vmatprep.subr.msk.bf16.mxu0 %vm674_vm1, %v558_v8  ;;  %v216_v17 = vld [vmem:[%s670_s21 + $0xa8] sm:$0xff]  ;;  %v567_v18 = vpack.c.bf16 %v198_v15, %v197_v14  ;;  %v199_v20 = vld [vmem:[%s670_s21 + $0x20] sm:$0xff]  ;;  %v217_v22 = vld [vmem:[%s670_s21 + $0xb0] sm:$0xff] }
  0x16   : > { %563 = vmatpush3.bf16.xpose.msk.msra.mxu0 %vm674_vm1, %v561_v12  ;;  %v570_v19 = vpack.c.bf16 %v216_v17, %v215_v16  ;;  %v200_v21 = vld [vmem:[%s670_s21 + $0x28] sm:$0xff]  ;;  %v218_v23 = vld [vmem:[%s670_s21 + $0xb8] sm:$0xff]  ;;  %v201_v26 = vld [vmem:[%s670_s21 + $0x30] sm:$0xff] }
  0x17   : > { %566 = vmatprep.subr.msk.bf16.mxu0 %vm674_vm1, %v564_v13  ;;  %v573_v24 = vpack.c.bf16 %v200_v21, %v199_v20  ;;  %v576_v25 = vpack.c.bf16 %v218_v23, %v217_v22  ;;  %v202_v27 = vld [vmem:[%s670_s21 + $0x38] sm:$0xff]  ;;  %v219_v28 = vld [vmem:[%s670_s21 + $0xc0] sm:$0xff]  ;;  %v220_v29 = vld [vmem:[%s670_s21 + $0xc8] sm:$0xff] }
  0x18   : > { %v579_v30 = vpack.c.bf16 %v202_v27, %v201_v26  ;;  %v582_v31 = vpack.c.bf16 %v220_v29, %v219_v28  ;;  %v203_v32 = vld [vmem:[%s670_s21 + $0x40] sm:$0xff]  ;;  %v204_v33 = vld [vmem:[%s670_s21 + $0x48] sm:$0xff]  ;;  %v221_v34 = vld [vmem:[%s670_s21 + $0xd0] sm:$0xff] }
  0x19   : > { %v222_v35 = vld [vmem:[%s670_s21 + $0xd8] sm:$0xff]  ;;  %v585_v36 = vpack.c.bf16 %v204_v33, %v203_v32  ;;  %v205_v38 = vld [vmem:[%s670_s21 + $0x50] sm:$0xff]  ;;  %v223_v40 = vld [vmem:[%s670_s21 + $0xe0] sm:$0xff] }
  0x1a   : > { %v588_v37 = vpack.c.bf16 %v222_v35, %v221_v34  ;;  %v206_v39 = vld [vmem:[%s670_s21 + $0x58] sm:$0xff]  ;;  %v224_v41 = vld [vmem:[%s670_s21 + $0xe8] sm:$0xff]  ;;  %v207_v44 = vld [vmem:[%s670_s21 + $0x60] sm:$0xff] }
  0x1b   : > { %v591_v42 = vpack.c.bf16 %v206_v39, %v205_v38  ;;  %v594_v43 = vpack.c.bf16 %v224_v41, %v223_v40  ;;  %v208_v45 = vld [vmem:[%s670_s21 + $0x68] sm:$0xff]  ;;  %v225_v46 = vld [vmem:[%s670_s21 + $0xf0] sm:$0xff]  ;;  %v226_v47 = vld [vmem:[%s670_s21 + $0xf8] sm:$0xff] }
  0x1c   : > { %v597_v48 = vpack.c.bf16 %v208_v45, %v207_v44  ;;  %v600_v49 = vpack.c.bf16 %v226_v47, %v225_v46  ;;  %v209_v50 = vld [vmem:[%s670_s21 + $0x70] sm:$0xff]  ;;  %v210_v51 = vld [vmem:[%s670_s21 + $0x78] sm:$0xff] }
  0x1d   : > { %v603_v52 = vpack.c.bf16 %v210_v51, %v209_v50 }
  0x1e   : > { %569 = vmatpush3.bf16.xpose.msk.msra.mxu0 %vm674_vm1, %v567_v18 }
  0x1f   : > { %572 = vmatprep.subr.msk.bf16.mxu0 %vm674_vm1, %v570_v19 }
  0x26   : > { %575 = vmatpush3.bf16.xpose.msk.msra.mxu0 %vm674_vm1, %v573_v24 }
  0x27   : > { %578 = vmatprep.subr.msk.bf16.mxu0 %vm674_vm1, %v576_v25 }
  0x2e   : > { %581 = vmatpush3.bf16.xpose.msk.msra.mxu0 %vm674_vm1, %v579_v30 }
  0x2f   : > { %584 = vmatprep.subr.msk.bf16.mxu0 %vm674_vm1, %v582_v31 }
  0x36   : > { %587 = vmatpush3.bf16.xpose.msk.msra.mxu0 %vm674_vm1, %v585_v36 }
  0x37   : > { %590 = vmatprep.subr.msk.bf16.mxu0 %vm674_vm1, %v588_v37 }
  0x3e   : > { %593 = vmatpush3.bf16.xpose.msk.msra.mxu0 %vm674_vm1, %v591_v42 }
  0x3f   : > { %596 = vmatprep.subr.msk.bf16.mxu0 %vm674_vm1, %v594_v43 }
  0x46   : > { %599 = vmatpush3.bf16.xpose.msk.msra.mxu0 %vm674_vm1, %v597_v48 }
  0x47   : > { %602 = vmatprep.subr.msk.bf16.mxu0 %vm674_vm1, %v600_v49 }
  0x4e   : > { %605 = vmatpush3.bf16.xpose.msk.msra.mxu0 %vm674_vm1, %v603_v52 }
  0x55   : > { %557 = vmatmul.mubr.msk.f32.vlgmr.msra.gmra.mrb[0].mxu0 %vm237_vm0, %v663_v1 }
  0x89   : > { %v231_v56 = vpop.permute.xlu0 %230 }
  0x8a   : > { %v236_v59 = vrot.slane %v231_v56, %v235_v55 }
 0x128   : > { %v403_v61 = vpop.f32.mrb[0].mxu0 }
 0x129   : > { %v404_v62 = vadd.f32 %v403_v61, %v236_v59  ;;  %v405_v63 = vpop.f32.mrb[1].mxu0 }
 0x12a   : > { %v406_v0 = vadd.f32 %v405_v63, %v236_v59 }
 0x12c   : > { %v410_v3 = vcombine.low %v404_v62, %v406_v0 }
 0x12e   : > { %v417_v4 = vrot.slane %v410_v3, %v416_v2 }
 0x130   : > { %v424_v1 = vrot.slane %v417_v4, %v416_v2 }
 0x132   : > { %430 = vst.msk [vmem:[%s192_s25] sm:$0x3] %vm428_vm2, %v424_v1 }
 0x133 PF: > { %s15_s14 = sadd.s32 1, %s623_s14  }
 0x134   : > { %p12_p5 = scmp.ge.s32.totalorder %s15_s14, 4  }
 0x136   :  { %14 = sbr.rel (!%p12_p5) target bundleno = 3 (0x3), region = 62 }

</bundles_post_ra>
